<compile_context>
chip_gen: v5e
topology: v5e:2x2
jax: 0.10.0
libtpu: 0.0.40
codegen_flags: <defaults>
</compile_context>

<pallas_src>
import functools

import jax
import jax.numpy as jnp
from jax.experimental import pallas as pl
from jax.experimental.pallas import tpu as pltpu


_TILE_TARGET_BYTES = 6 * 1024 * 1024     # ~6 MiB row tiles (e.g. 2048 x 768 f32)
_MAX_TILE_ROWS = 4096
_VMEM_HEADROOM_BYTES = 8 * 1024 * 1024   # slack for compiler scratch / future fusion
_VMEM_FLOOR_BYTES = 24 * 1024 * 1024
_VMEM_CAP_BYTES = 56 * 1024 * 1024       # stay well under v7x's 64 MiB per-TC VMEM
_NSPLIT_MAX = 2                          # v7x has 2 TensorCores per chip


def _choose_row_tile(n_rows, n_cols, itemsize):
    """Row-tile size: multiple of 8, ~6 MiB, capped; full array if it already fits."""
    rows = _TILE_TARGET_BYTES // max(1, n_cols * itemsize)
    rows = max(8, min(_MAX_TILE_ROWS, rows))
    rows = max(8, (rows // 8) * 8)
    if rows >= n_rows:
        return n_rows  # single block equal to the full array dim (always legal)
    return rows


def _vmem_limit(buffer_bytes):
    """Derive the scoped-VMEM request from the actual buffer footprint."""
    return int(min(_VMEM_CAP_BYTES,
                   max(_VMEM_FLOOR_BYTES, buffer_bytes + _VMEM_HEADROOM_BYTES)))


def _stats_kernel(x_ref, out_ref, *, tiles_per_split, n_full, rem):
    """Pass 1: per-split, per-channel packed [sum; sum-of-squares] over valid rows.

    out_ref is a resident (1, 2, C) block (one per split).  Full tiles accumulate
    unmasked; only the single partial last tile pays the iota/where mask; ghost tiles
    (global index past the last tile, from rounding tiles_per_split up) add nothing.
    """
    c = pl.program_id(0)          # split (TensorCore shard on v7x)
    i = pl.program_id(1)          # row-tile within this split (reduction axis)
    g = c * tiles_per_split + i   # global row-tile index

    @pl.when(i == 0)
    def _():
        out_ref[...] = jnp.zeros_like(out_ref)

    def accumulate(x):
        s = jnp.sum(x, axis=0, keepdims=True)        # (1, C)
        sq = jnp.sum(x * x, axis=0, keepdims=True)   # (1, C)
        out_ref[...] += jnp.concatenate([s, sq], axis=0)[None]   # (1, 2, C)

    # Full tiles: no row mask (keeps v6e/v7x at the HBM roofline instead of VALU-bound).
    @pl.when(g < n_full)
    def _():
        accumulate(x_ref[...].astype(jnp.float32))

    if rem:
        # Only the one partial last tile is masked (padded rows are undefined and must
        # not pollute the global statistics).
        @pl.when(g == n_full)
        def _():
            x = x_ref[...].astype(jnp.float32)
            row = jax.lax.broadcasted_iota(jnp.int32, x.shape, 0)
            accumulate(jnp.where(row < rem, x, 0.0))


def _apply_kernel(x_ref, stats_ref, gamma_ref, beta_ref, alpha_ref, o_ref, *, inv_n, eps):
    """Pass 2: in-kernel fold of BN stats + alpha into per-channel (a, b), then y = a*x + b.

    The fold is O(C) work (a few vregs) vs. O(tm*C) for the affine, so recomputing it on
    every row tile is negligible and avoids any cross-TensorCore scratch handoff when the
    row tiles shard across cores.
    NOTE: var = E[x^2] - mean^2 in f32 can lose precision if |mean| >> std; fine for
    normalized transformer activations, revisit (centered second pass) if that regime occurs.
    """
    totals = jnp.sum(stats_ref[...], axis=0)                 # (2, C): [sum; sumsq] over splits
    mean = totals[0:1, :] * inv_n                            # (1, C)
    var = jnp.maximum(totals[1:2, :] * inv_n - mean * mean, 0.0)   # biased, like BN forward
    inv_std = jax.lax.rsqrt(var + eps)
    scale = gamma_ref[...].astype(jnp.float32) * inv_std     # (1, C)
    a = scale + alpha_ref[0]                                 # alpha folded in
    b = beta_ref[...].astype(jnp.float32) - scale * mean

    x = x_ref[...].astype(jnp.float32)
    o_ref[...] = (x * a + b).astype(o_ref.dtype)


def repbn_forward(x, gamma, beta, alpha, *, eps=1e-5, row_tile=None):
    """x: (B, T, C). Returns RepBN(x) with training-mode (biased) batch statistics.

    No running_mean/running_var update is produced (fresh-module training forward only).
    """
    B, T, C = x.shape
    N = B * T
    x2d = x.reshape(N, C)
    in_itemsize = int(x2d.dtype.itemsize)

    if row_tile is None:
        tm = _choose_row_tile(N, C, in_itemsize)
    else:
        tm = min(int(row_tile), N)
        assert tm == N or tm % 8 == 0, "row_tile must be a multiple of 8 or cover all rows"

    total_tiles = pl.cdiv(N, tm)
    n_full, rem = divmod(N, tm)
    nsplit = _NSPLIT_MAX if total_tiles >= _NSPLIT_MAX else 1
    tiles_per_split = pl.cdiv(total_tiles, nsplit)
    last_tile = total_tiles - 1
    tile_in_bytes = tm * C * in_itemsize
    tile_out_bytes = tm * C * in_itemsize

    # ---- pass 1: per-split per-channel [sum; sumsq] (2-way core split on v7x) -------
    def x_index_stats(c, i):
        g = c * tiles_per_split + i
        return (jnp.minimum(g, last_tile), 0)   # clamp ghost tiles to a valid block

    stats = pl.pallas_call(
        functools.partial(_stats_kernel, tiles_per_split=tiles_per_split,
                          n_full=n_full, rem=rem),
        out_shape=jax.ShapeDtypeStruct((nsplit, 2, C), jnp.float32),
        grid=(nsplit, tiles_per_split),
        in_specs=[pl.BlockSpec((tm, C), x_index_stats)],
        out_specs=pl.BlockSpec((1, 2, C), lambda c, i: (c, 0, 0)),
        compiler_params=pltpu.CompilerParams(
            dimension_semantics=("parallel", "arbitrary"),
            vmem_limit_bytes=_vmem_limit(2 * tile_in_bytes + 2 * 2 * C * 4),
        ),
    )(x2d)

    # ---- pass 2: fused stats-fold + per-channel affine, row tiles parallel ----------
    gamma2d = gamma.reshape(1, C)
    beta2d = beta.reshape(1, C)
    alpha1 = jnp.asarray(alpha, jnp.float32).reshape(1)

    small_bytes = 2 * (nsplit * 2 * C + 2 * C) * 4
    out2d = pl.pallas_call(
        functools.partial(_apply_kernel, inv_n=1.0 / N, eps=float(eps)),
        out_shape=jax.ShapeDtypeStruct((N, C), x.dtype),
        grid=(total_tiles,),
        in_specs=[
            pl.BlockSpec((tm, C), lambda i: (i, 0)),
            pl.BlockSpec((nsplit, 2, C), lambda i: (0, 0, 0)),
            pl.BlockSpec((1, C), lambda i: (0, 0)),
            pl.BlockSpec((1, C), lambda i: (0, 0)),
            pl.BlockSpec(memory_space=pltpu.MemorySpace.SMEM),   # scalar alpha
        ],
        out_specs=pl.BlockSpec((tm, C), lambda i: (i, 0)),
        compiler_params=pltpu.CompilerParams(
            dimension_semantics=("parallel",),
            vmem_limit_bytes=_vmem_limit(
                2 * tile_in_bytes + 2 * tile_out_bytes + small_bytes),
        ),
    )(x2d, stats, gamma2d, beta2d, alpha1)

    return out2d.reshape(B, T, C)


def repbn_reference(x, gamma, beta, alpha, *, eps=1e-5):
    """Pure-JAX reference: BatchNorm1d on (B, C, T) in training mode + alpha*x."""
    xt = jnp.transpose(x, (0, 2, 1))  # (B, C, T)
    mean = jnp.mean(xt, axis=(0, 2), keepdims=True)
    var = jnp.mean((xt - mean) ** 2, axis=(0, 2), keepdims=True)
    bn = gamma.reshape(1, -1, 1) * (xt - mean) / jnp.sqrt(var + eps) + beta.reshape(1, -1, 1)
    y = bn + alpha.reshape(1, 1, 1) * xt
    return jnp.transpose(y, (0, 2, 1))


if __name__ == "__main__":
    key = jax.random.PRNGKey(0)
    k1, k2, k3, k4, k5, k6, k7 = jax.random.split(key, 7)

    # Case 1: f32, lane-dense C=128, forced small row tiles -> multi-tile grid with a
    # partial (masked) last tile and a ghost tile on the 2-way split path.
    B, T, C = 2, 9, 128
    x = jax.random.normal(k1, (B, T, C), dtype=jnp.float32)
    gamma = 1.0 + 0.1 * jax.random.normal(k2, (C,), dtype=jnp.float32)
    beta = 0.1 * jax.random.normal(k3, (C,), dtype=jnp.float32)
    alpha = jnp.ones((1,), dtype=jnp.float32)
    out = jax.block_until_ready(repbn_forward(x, gamma, beta, alpha, row_tile=8))
    ref = repbn_reference(x, gamma, beta, alpha)
    assert out.shape == (B, T, C)
    assert jnp.allclose(out, ref, atol=1e-4, rtol=1e-4), "mismatch (f32, multi-tile case)"

    # Case 2: bf16 I/O (intended production dtype), f32 stats/affine math, 2-way split.
    B2, T2, C2 = 2, 16, 256
    x_bf = jax.random.normal(k4, (B2, T2, C2), dtype=jnp.float32).astype(jnp.bfloat16)
    gamma2 = 1.0 + 0.1 * jax.random.normal(k5, (C2,), dtype=jnp.float32)
    beta2 = 0.1 * jax.random.normal(k6, (C2,), dtype=jnp.float32)
    alpha2 = jnp.full((1,), 0.5, dtype=jnp.float32)
    out_bf = jax.block_until_ready(repbn_forward(x_bf, gamma2, beta2, alpha2, row_tile=16))
    assert out_bf.dtype == jnp.bfloat16
    ref_bf = repbn_reference(x_bf.astype(jnp.float32), gamma2, beta2, alpha2)
    assert jnp.allclose(out_bf.astype(jnp.float32), ref_bf, atol=6e-2, rtol=6e-2), \
        "mismatch (bf16 I/O case)"

    # Case 3: narrow channel (C < 128 -> masked lane stores), default single-block tile.
    B3, T3, C3 = 2, 8, 32
    x3 = jax.random.normal(k7, (B3, T3, C3), dtype=jnp.float32)
    gamma3 = jnp.ones((C3,), dtype=jnp.float32)
    beta3 = jnp.zeros((C3,), dtype=jnp.float32)
    alpha3 = jnp.full((1,), 0.5, dtype=jnp.float32)
    out3 = jax.block_until_ready(repbn_forward(x3, gamma3, beta3, alpha3))
    ref3 = repbn_reference(x3, gamma3, beta3, alpha3)
    assert jnp.allclose(out3, ref3, atol=1e-4, rtol=1e-4), "mismatch (narrow-C case)"

    print("KERNEL_OK")
</pallas_src>

<mosaic_0001>
module attributes {stable_mosaic.version = 11 : i64} {
  func.func @_stats_kernel(%arg0: i32, %arg1: i32, %arg2: memref<8x128xf32, #tpu.memory_space<vmem>>, %arg3: memref<1x2x128xf32, #tpu.memory_space<vmem>>) attributes {dimension_semantics = [#tpu.dimension_semantics<parallel>, #tpu.dimension_semantics<arbitrary>], iteration_bounds = array<i64: 2, 2>, scalar_prefetch = 0 : i64, scratch_operands = 0 : i64, tpu.core_type = #tpu.core_type<tc>, window_params = [{transform_indices = @transform_0, window_bounds = array<i64: 8, 128>}, {transform_indices = @transform_1, window_bounds = array<i64: 1, 2, 128>}]} {
    %c2_i32 = arith.constant 2 : i32
    %0 = arith.muli %arg0, %c2_i32 : i32
    %1 = arith.addi %0, %arg1 : i32
    %c0_i32 = arith.constant 0 : i32
    %2 = arith.cmpi eq, %arg1, %c0_i32 : i32
    %3 = arith.extui %2 : i1 to i32
    %c0_i32_0 = arith.constant 0 : i32
    %4 = arith.cmpi ne, %3, %c0_i32_0 : i32
    scf.if %4 {
      %cst = arith.constant 0.000000e+00 : f32
      %11 = vector.broadcast %cst : f32 to vector<1x2x128xf32>
      %c0 = arith.constant 0 : index
      %c0_5 = arith.constant 0 : index
      %c0_6 = arith.constant 0 : index
      %12 = vector.load %arg3[%c0, %c0_5, %c0_6] : memref<1x2x128xf32, #tpu.memory_space<vmem>>, vector<1x2x128xf32>
      tpu.vector_store %arg3[%c0, %c0_5, %c0_6], %11 {strides = array<i32>} : memref<1x2x128xf32, #tpu.memory_space<vmem>>, vector<1x2x128xf32>,
    } else {
    }
    %c2_i32_1 = arith.constant 2 : i32
    %5 = arith.cmpi slt, %1, %c2_i32_1 : i32
    %6 = arith.extui %5 : i1 to i32
    %c0_i32_2 = arith.constant 0 : i32
    %7 = arith.cmpi ne, %6, %c0_i32_2 : i32
    scf.if %7 {
      %c0 = arith.constant 0 : index
      %c0_5 = arith.constant 0 : index
      %11 = vector.load %arg2[%c0, %c0_5] : memref<8x128xf32, #tpu.memory_space<vmem>>, vector<8x128xf32>
      %cst = arith.constant dense<0.000000e+00> : vector<128xf32>
      %12 = vector.multi_reduction <add>, %11, %cst [0] : vector<8x128xf32> to vector<128xf32>
      %13 = vector.shape_cast %12 : vector<128xf32> to vector<1x128xf32>
      %14 = arith.mulf %11, %11 : vector<8x128xf32>
      %cst_6 = arith.constant dense<0.000000e+00> : vector<128xf32>
      %15 = vector.multi_reduction <add>, %14, %cst_6 [0] : vector<8x128xf32> to vector<128xf32>
      %16 = vector.shape_cast %15 : vector<128xf32> to vector<1x128xf32>
      %c0_7 = arith.constant 0 : index
      %c0_8 = arith.constant 0 : index
      %c0_9 = arith.constant 0 : index
      %17 = vector.load %arg3[%c0_7, %c0_8, %c0_9] : memref<1x2x128xf32, #tpu.memory_space<vmem>>, vector<1x2x128xf32>
      %18 = tpu.concatenate %13, %16 in 0 : vector<1x128xf32>, vector<1x128xf32> -> vector<2x128xf32>
      %19 = vector.shape_cast %18 : vector<2x128xf32> to vector<1x2x128xf32>
      %20 = arith.addf %17, %19 : vector<1x2x128xf32>
      %c0_10 = arith.constant 0 : index
      %c0_11 = arith.constant 0 : index
      %c0_12 = arith.constant 0 : index
      %21 = vector.load %arg3[%c0_10, %c0_11, %c0_12] : memref<1x2x128xf32, #tpu.memory_space<vmem>>, vector<1x2x128xf32>
      tpu.vector_store %arg3[%c0_10, %c0_11, %c0_12], %20 {strides = array<i32>} : memref<1x2x128xf32, #tpu.memory_space<vmem>>, vector<1x2x128xf32>,
    } else {
    }
    %c2_i32_3 = arith.constant 2 : i32
    %8 = arith.cmpi eq, %1, %c2_i32_3 : i32
    %9 = arith.extui %8 : i1 to i32
    %c0_i32_4 = arith.constant 0 : i32
    %10 = arith.cmpi ne, %9, %c0_i32_4 : i32
    scf.if %10 {
      %c0 = arith.constant 0 : index
      %c0_5 = arith.constant 0 : index
      %11 = vector.load %arg2[%c0, %c0_5] : memref<8x128xf32, #tpu.memory_space<vmem>>, vector<8x128xf32>
      %12 = tpu.iota {dimensions = array<i32: 0>} : vector<8x128xi32>
      %c2_i32_6 = arith.constant 2 : i32
      %13 = vector.broadcast %c2_i32_6 : i32 to vector<8x128xi32>
      %14 = arith.cmpi slt, %12, %13 : vector<8x128xi32>
      %cst = arith.constant 0.000000e+00 : f32
      %15 = vector.broadcast %cst : f32 to vector<8x128xf32>
      %16 = arith.select %14, %11, %15 : vector<8x128xi1>, vector<8x128xf32>
      %cst_7 = arith.constant dense<0.000000e+00> : vector<128xf32>
      %17 = vector.multi_reduction <add>, %16, %cst_7 [0] : vector<8x128xf32> to vector<128xf32>
      %18 = vector.shape_cast %17 : vector<128xf32> to vector<1x128xf32>
      %19 = arith.mulf %16, %16 : vector<8x128xf32>
      %cst_8 = arith.constant dense<0.000000e+00> : vector<128xf32>
      %20 = vector.multi_reduction <add>, %19, %cst_8 [0] : vector<8x128xf32> to vector<128xf32>
      %21 = vector.shape_cast %20 : vector<128xf32> to vector<1x128xf32>
      %c0_9 = arith.constant 0 : index
      %c0_10 = arith.constant 0 : index
      %c0_11 = arith.constant 0 : index
      %22 = vector.load %arg3[%c0_9, %c0_10, %c0_11] : memref<1x2x128xf32, #tpu.memory_space<vmem>>, vector<1x2x128xf32>
      %23 = tpu.concatenate %18, %21 in 0 : vector<1x128xf32>, vector<1x128xf32> -> vector<2x128xf32>
      %24 = vector.shape_cast %23 : vector<2x128xf32> to vector<1x2x128xf32>
      %25 = arith.addf %22, %24 : vector<1x2x128xf32>
      %c0_12 = arith.constant 0 : index
      %c0_13 = arith.constant 0 : index
      %c0_14 = arith.constant 0 : index
      %26 = vector.load %arg3[%c0_12, %c0_13, %c0_14] : memref<1x2x128xf32, #tpu.memory_space<vmem>>, vector<1x2x128xf32>
      tpu.vector_store %arg3[%c0_12, %c0_13, %c0_14], %25 {strides = array<i32>} : memref<1x2x128xf32, #tpu.memory_space<vmem>>, vector<1x2x128xf32>,
    } else {
    }
    return
  }
  func.func @transform_0(%arg0: i32, %arg1: i32) -> (i32, i32) {
    %c2_i32 = arith.constant 2 : i32
    %0 = arith.muli %arg0, %c2_i32 : i32
    %1 = arith.addi %0, %arg1 : i32
    %c2_i32_0 = arith.constant 2 : i32
    %2 = arith.minsi %1, %c2_i32_0 : i32
    %c0_i32 = arith.constant 0 : i32
    %c0_i32_1 = arith.constant 0 : i32
    return %2, %c0_i32 : i32, i32
  }
  func.func @transform_1(%arg0: i32, %arg1: i32) -> (i32, i32, i32) {
    %c0_i32 = arith.constant 0 : i32
    %c0_i32_0 = arith.constant 0 : i32
    %c0_i32_1 = arith.constant 0 : i32
    return %arg0, %c0_i32, %c0_i32_0 : i32, i32, i32
  }
}

</mosaic_0001>

<bundles_post_ra>
// kernel: tpu_custom_call.1
= control target key start
LH: loop header
LB: loop body
LE: loop exit
PB: predicated region body
PF: predicated region fallthrough
CT: control target
= control target key end

     0   :  { %6 = vsyncpa [#allocation3], 0  ;;  %s809_s0 = inlined_call_operand.hbm [shape: f32[18,128], index: 0, kind: input, shape index: {}]   ;;  %s810_s1 = inlined_call_operand.hbm [shape: f32[2,2,128], index: 1, kind: output, shape index: {}]  }
   0x1   :  { %8 = vsyncpa [#allocation3 + $0x1], 0 }
   0x2   :  { %9 = vsyncpa [#allocation4], 0 }
   0x3   :  { %11 = vsyncpa [#allocation4 + $0x1], 0  ;;  %s605_s6 = smov 0   ;;  %s607_s7 = smov 0  }
   0x4   :  { %s609_s8 = smov 0   ;;  %s611_s9 = smov 0  }
   0x5   :  { %s613_s10 = smov 0   ;;  %s615_s11 = smov 0  }
   0x6   :  { %s617_s12 = smov 0   ;;  %s619_s13 = smov 0  }
   0x7   :  { %s621_s14 = smov 0   ;;  %s623_s15 = smov 0  }
   0x8   :  { %s625_s16 = smov 0  }
   0x9 LB: > { %s316_s17 = sadd.s32 4294967295, %s592_s16   ;;  %s317_s18 = sadd.s32 4294967294, %s592_s16   ;;  %s592_s16 = sphi %s625_s16, %s17_s16   ;;  %s588_s15 = sphi %s623_s15, %s827_s15   ;;  %s584_s14 = sphi %s621_s14, %s826_s14   ;;  %s580_s13 = sphi %s619_s13, %s825_s13   ;;  %s576_s12 = sphi %s617_s12, %s824_s12   ;;  %s572_s11 = sphi %s615_s11, %s823_s11   ;;  %s568_s10 = sphi %s613_s10, %s822_s10   ;;  %s564_s9 = sphi %s611_s9, %s821_s9   ;;  %s560_s8 = sphi %s609_s8, %s820_s8   ;;  %s556_s7 = sphi %s607_s7, %s819_s7   ;;  %s552_s6 = sphi %s605_s6, %s818_s6  }
   0xa   : > { %s26_s19 = sadd.s32 1, %s584_s14  ;;  %s29_s20 = sadd.s32 1, %s588_s15 }
   0xb   : > { %p27_p0 = scmp.ge.s32.totalorder %s26_s19, 2  ;;  %s318_s21 = sshll.u32 %s588_s15, 1 }
   0xc   : > { %s34_s22 = sadd.s32 %s584_s14, %s318_s21  ;;  %s44_s23 = sadd.s32 1, %s572_s11 }
   0xd   : > { %s829_s19 = smov (%p27_p0, %s26_s19), 0  ;;  %s831_s20 = smov (!%p27_p0, %s29_s20), %s588_s15 }
   0xe   : > { %p35_p1 = scmp.lt.s32.totalorder %s34_s22, 2  ;;  %p51_p2 = scmp.ne.s32.totalorder %s572_s11, %s568_s10 }
   0xf   : > { %p31_p3 = scmp.ge.s32.totalorder %s831_s20, 2  ;;  %p52_p4 = scmp.eq.s32.totalorder %s592_s16, 0 }
  0x10   : > { %s833_s22 = smov (!%p35_p1, %s34_s22), 2  ;;  %p57_p6 = scmp.ne.s32.totalorder %s568_s10, %s564_s9 }
  0x11   : > { %s835_s20 = smov (%p31_p3, %s831_s20), 0  ;;  %p675_p5 = por %p52_p4, %p51_p2 }
  0x12   : > { %812 = sst [smem:[#allocation8_spill]] %s835_s20  ;;  %s319_s25 = sshll.u32 %s835_s20, 1 }
  0x13   : > { %p58_p7 = scmp.eq.s32.totalorder %s316_s17, 0  ;;  %s38_s26 = sadd.s32 %s319_s25, %s829_s19 }
  0x14   : > { %s67_s27 = ssub.s32 %s588_s15, %s835_s20  ;;  %p39_p8 = scmp.lt.s32.totalorder %s38_s26, 2 }
  0x15   : > { %p687_p9 = por %p58_p7, %p57_p6  ;;  %p68_p10 = scmp.eq.s32.totalorder %s67_s27, 0 }
  0x16   : > { %s70_s29 = sadd.s32 1, %s560_s8  ;;  %s837_s26 = smov (!%p39_p8, %s38_s26), 2 }
  0x17   : > { %s693_s30 = scalar_select %p68_p10, %s560_s8, %s70_s29  }
  0x18   : > { %s41_s2 = ssub.s32 %s833_s22, %s837_s26  ;;  %p80_p11 = scmp.ne.s32.totalorder %s560_s8, %s556_s7 }
  0x19   : > { %p42_p12 = scmp.eq.s32.totalorder %s41_s2, 0  ;;  %p81_p13 = scmp.eq.s32.totalorder %s316_s17, 3 }
  0x1a   : > { %p86_p0 = scmp.ne.s32.totalorder %s556_s7, %s552_s6  ;;  %p87_p1 = scmp.eq.s32.totalorder %s317_s18, 3 }
  0x1b   : > { %s704_s3 = scalar_select %p42_p12, %s572_s11, %s44_s23  }
  0x1c   : > { %p706_p2 = por %p81_p13, %p80_p11  ;;  %p710_p3 = por %p87_p1, %p86_p0 }
  0x1d   : > { %p349_p4 = scmp.lt.s32.totalorder %s592_s16, 4  ;;  %s107_s9 = sand.u32 1, %s572_s11  }
  0x1e   : > { %s324_s21 = sshll.u32 %s833_s22, 3  ;;  %s322_s17 = sshll.u32 %s107_s9, 3 }
  0x1f   : > { %s119_s27 = scalar_lea.hbm %s809_s0, %s324_s21  ;;  %s111_s29 = scalar_lea.vmem [#allocation2], %s322_s17 }
  0x20   : > { %s121_s18 = sshll.u32 %s119_s27, 4  ;;  %s123_s23 = sshll.u32 %s111_s29, 4  ;;  %s122_s18 = int_to_ptr.hbm [resolvable:$true] %s121_s18  ;;  %s124_s23 = int_to_ptr.vmem [resolvable:$true] %s123_s23 }
  0x21   : > { %p342_p6 = pnand %p349_p4, %p675_p5  ;;  %p325_p7 = scmp.ge.s32.totalorder %s592_s16, 1 }
  0x22   : > { %p128_p8 = scmp.lt.s32.totalorder %s592_s16, 5  ;;  %s108_s2 = scalar_lea.sflag [#allocation3], %s107_s9 }
  0x23   : > { %344 = dma.hbm_to_vmem [thread:$0]  (!%p342_p6), %s122_s18, 128, %s124_s23, %s108_s2  }
  0x24   : > { %p129_p10 = pnand %p325_p7, %p128_p8 }
  0x25   : > { %s134_s22 = sand.u32 (!%p129_p10), 1, %s568_s10  }
  0x26   : > { %132 = sbr.rel (%p129_p10) target bundleno = 121 (0x79), region = 24  ;;  %s724_s20 = sshll.u32 (!%p129_p10), %s134_s22, 3 }
  0x27   : > { %s135_s21 = scalar_lea.sflag (!%p129_p10), [#allocation3], %s134_s22  ;;  %s138_s25 = scalar_lea.vmem (!%p129_p10), [#allocation2], %s724_s20 }
  0x2b   : > { %543 = dma.done.wait (%p687_p9), %s135_s21, 128  }
  0x2c   : > { %545 = vsyncadd (%p687_p9), %s135_s21, 4294967168  ;;  %s155_s24 = sand.u32 1, %s556_s7   ;;  %s328_s9 = sshll.u32 %s580_s13, 1 }
  0x2d   : > { %s327_s17 = sshll.u32 %s155_s24, 1  ;;  %s738_s26 = sadd.s32 %s576_s12, %s328_s9 }
  0x2e   : > { %s740_s27 = scalar_lea.vmem [#allocation5], %s327_s17  ;;  %p329_p5 = scmp.ne.s32.totalorder %s576_s12, 0 }
  0x30   : > { %167 = sbr.rel (%p329_p5) target bundleno = 55 (0x37), region = 32 }
  0x35   : > { %v594_v0 = vmov 0.0  }
  0x36   : > { %168 = vst [vmem:[%s740_s27] sm:$0x3] %v594_v0 }
  0x37 PF: > { %p330_p9 = scmp.ge.s32.totalorder %s738_s26, 2 }
  0x39   : > { %172 = sbr.rel (%p330_p9) target bundleno = 81 (0x51), region = 36 }
  0x3e   : > { %v173_v1 = vld [vmem:[%s138_s25] sm:$0xff]  ;;  %vm188_vm0 = vcmask 1040384   ;;  %v187_v15 = vld [vmem:[%s740_s27] sm:$0x3] }
  0x3f   : > { %v174_v2 = vrot.slane %v173_v1, 4  ;;  %v180_v3 = vmul.f32 %v173_v1, %v173_v1 }
  0x41   : > { %v175_v4 = vadd.f32 %v174_v2, %v173_v1  ;;  %v181_v5 = vrot.slane %v180_v3, 4 }
  0x43   : > { %v176_v6 = vrot.slane %v175_v4, 2  ;;  %v182_v7 = vadd.f32 %v181_v5, %v180_v3 }
  0x45   : > { %v177_v8 = vadd.f32 %v176_v6, %v175_v4  ;;  %v183_v9 = vrot.slane %v182_v7, 2 }
  0x47   : > { %v178_v10 = vrot.slane %v177_v8, 1  ;;  %v184_v11 = vadd.f32 %v183_v9, %v182_v7 }
  0x49   : > { %v179_v12 = vadd.f32 %v178_v10, %v177_v8  ;;  %v185_v13 = vrot.slane %v184_v11, 1 }
  0x4b   : > { %v186_v14 = vadd.f32 %v185_v13, %v184_v11 }
  0x4d   : > { %v189_v16 = vsel %vm188_vm0, %v179_v12, %v186_v14 }
  0x4e   : > { %v190_v17 = vadd.f32 %v189_v16, %v187_v15 }
  0x50   : > { %191 = vst [vmem:[%s740_s27] sm:$0x3] %v190_v17 }
  0x51 PF: > { %p331_p11 = scmp.ne.s32.totalorder %s738_s26, 2 }
  0x53   : > { %195 = sbr.rel (%p331_p11) target bundleno = 107 (0x6b), region = 40 }
  0x58   : > { %v332_v18 = vld [vmem:[%s138_s25] sm:$0x3]  ;;  %vm215_vm1 = vcmask 1040384   ;;  %v214_v32 = vld [vmem:[%s740_s27] sm:$0x3] }
  0x59   : > { %v201_v19 = vrot.slane %v332_v18, 4  ;;  %v207_v20 = vmul.f32 %v332_v18, %v332_v18 }
  0x5b   : > { %v202_v21 = vadd.f32 %v332_v18, %v201_v19  ;;  %v208_v22 = vrot.slane %v207_v20, 4 }
  0x5d   : > { %v203_v23 = vrot.slane %v202_v21, 2  ;;  %v209_v24 = vadd.f32 %v208_v22, %v207_v20 }
  0x5f   : > { %v204_v25 = vadd.f32 %v203_v23, %v202_v21  ;;  %v210_v26 = vrot.slane %v209_v24, 2 }
  0x61   : > { %v205_v27 = vrot.slane %v204_v25, 1  ;;  %v211_v28 = vadd.f32 %v210_v26, %v209_v24 }
  0x63   : > { %v206_v29 = vadd.f32 %v205_v27, %v204_v25  ;;  %v212_v30 = vrot.slane %v211_v28, 1 }
  0x65   : > { %v213_v31 = vadd.f32 %v212_v30, %v211_v28 }
  0x67   : > { %v216_v33 = vsel %vm215_vm1, %v206_v29, %v213_v31 }
  0x68   : > { %v217_v34 = vadd.f32 %v216_v33, %v214_v32 }
  0x6a   : > { %218 = vst [vmem:[%s740_s27] sm:$0x3] %v217_v34 }
  0x6b PF: > { %s230_s28 = scalar_lea.hbm %s810_s1, %s328_s9  ;;  %s232_s18 = sshll.u32 %s740_s27, 4  ;;  %s233_s18 = int_to_ptr.vmem [resolvable:$true] %s232_s18 }
  0x6c   : > { %s234_s29 = sshll.u32 %s230_s28, 4  ;;  %s220_s23 = scalar_lea.sflag [#allocation4], %s155_s24  ;;  %s235_s29 = int_to_ptr.hbm [resolvable:$true] %s234_s29 }
  0x6d   : > { %s484_s2 = sshra.s32 %s235_s29, 4  ;;  %s490_s25 = scalar_lea.hbm %s810_s1, 4  ;;  %s485_s2 = int_to_ptr.hbm [resolvable:$true] %s484_s2 }
  0x6e   : > { %s486_s22 = scalar_lea.hbm %s485_s2, 2  ;;  %p491_p1 = scmp.lt.s32.totalorder %s485_s2, %s810_s1 }
  0x6f   : > { %p487_p12 = scmp.ne.s32.totalorder %s485_s2, %s486_s22  ;;  %p492_p4 = scmp.lt.s32.totalorder %s490_s25, %s486_s22 }
  0x71   : > { %p488_p13 = pnand %p487_p12, %p706_p2  ;;  %p493_p6 = por %p492_p4, %p491_p1 }
  0x73   : > { %p489_p0 = pneg %p488_p13 }
  0x75   : > { %p494_p7 = pnand %p493_p6, %p489_p0 }
  0x77   : > { %497 = shalt.err (!%p494_p7)
}
  0x78   : > { %339 = dma.vmem_to_hbm [thread:$0]  (%p706_p2), %s233_s18, 32, %s235_s29, %s220_s23  }
  0x79 PF: > { %p350_p8 = scmp.ge.s32.totalorder %s592_s16, 2  ;;  %s246_s24 = sand.u32 1, %s552_s6  }
  0x7a   : > { %s247_s9 = scalar_lea.sflag [#allocation4], %s246_s24 }
  0x7b   : > { %p346_p10 = pnand %p350_p8, %p710_p3 }
  0x7d   : > { %p347_p5 = pneg %p346_p10 }
  0x7f   : > { %547 = dma.done.wait (%p347_p5), %s247_s9, 32  }
  0x80   : > { %549 = vsyncadd (%p347_p5), %s247_s9, 4294967264  ;;  %s17_s16 = sadd.s32 1, %s592_s16   ;;  %s817_s4 = sld [smem:[#allocation8_spill]] }
  0x81   : > { %p14_p9 = scmp.ge.s32.totalorder %s17_s16, 6   ;;  %s818_s6 = smov %s556_s7 }
  0x82   : > { %s819_s7 = smov %s560_s8  ;;  %s820_s8 = smov %s693_s30 }
  0x83   : > { %s821_s9 = smov %s568_s10  ;;  %s822_s10 = smov %s572_s11 }
  0x84   : > { %s823_s11 = smov %s704_s3  ;;  %s824_s12 = smov %s584_s14 }
  0x85   : > { %s825_s13 = smov %s588_s15  ;;  %s826_s14 = smov %s829_s19 }
  0x86   : > { %s827_s15 = smov %s817_s4  ;;  %16 = sbr.rel (!%p14_p9) target bundleno = 9 (0x9), region = 81 }
  0x8b   :  { %253 = vsyncpa [#allocation3], 1 }
  0x8c   :  { %255 = vsyncpa [#allocation3 + $0x1], 1 }
  0x8d   :  { %256 = vsyncpa [#allocation4], 1 }
  0x8e   :  { %258 = vsyncpa [#allocation4 + $0x1], 1 }

</bundles_post_ra>
